<compile_context>
chip_gen: v5e
topology: v5e:2x2
jax: 0.10.0
libtpu: 0.0.40
codegen_flags: <defaults>
</compile_context>

<pallas_src>
import functools

import jax
import jax.numpy as jnp
from jax.experimental import pallas as pl
from jax.experimental.pallas import tpu as pltpu


def _round_up(x: int, m: int) -> int:
    return ((x + m - 1) // m) * m


def _choose_tile_n(n: int, d: int, k: int, z_itemsize: int) -> int:
    """Pick the N-tile from a VMEM budget; keep grid >= 4 when N allows."""
    budget = 24 * 1024 * 1024                       # safe on v7x (64 MiB physical)
    per_row = 2 * d * z_itemsize + 2 * k * 4        # double-buffered z + f32 out
    resident = 2 * (d * k * 4 + k * 4)              # centers + ||mu||^2
    tile = max(8, (budget - resident) // max(per_row, 1))
    tile = min(tile, 2048)                          # diminishing returns past ~2K rows
    tile = min(tile, _round_up(max(pl.cdiv(n, 4), 1), 8))  # grid >= 4 for megacore
    tile = min(tile, _round_up(n, 8))               # tiny inputs -> one small block
    tile = max(8, (tile // 8) * 8)                  # sublane alignment
    return tile


def _make_cluster_kernel(alpha: float):
    inv_alpha = 1.0 / float(alpha)
    p = (float(alpha) + 1.0) / 2.0

    def cluster_kernel(z_ref, wt_ref, wsq_ref, o_ref):
        z = z_ref[...].astype(jnp.float32)          # (TILE_N, D) in-register cast
        w_t = wt_ref[...]                           # (D, K) f32, resident
        w_sq = wsq_ref[...]                         # (1, K) f32, resident

        # squared Euclidean distance via expansion; cross term on the MXU
        z_sq = jnp.sum(z * z, axis=1, keepdims=True)                  # (TILE_N, 1)
        cross = jnp.dot(z, w_t, preferred_element_type=jnp.float32)   # (TILE_N, K)
        dist = jnp.maximum(z_sq + w_sq - 2.0 * cross, 0.0)            # clamp cancellation

        # Student-t kernel: 1 / (1 + dist/alpha); exact divide (memory-bound,
        # the VPU/EUP slack covers it, and the downstream KL target needs it).
        if inv_alpha == 1.0:
            q = 1.0 / (1.0 + dist)
        else:
            q = 1.0 / (1.0 + dist * inv_alpha)

        # q ** ((alpha+1)/2), specialized at trace time on the baked-in alpha
        if p == 1.0:
            pass                                    # alpha == 1: identity
        elif p == 0.5:
            q = jnp.sqrt(q)
        else:
            q = jnp.exp(p * jnp.log(q))             # q > 0 guaranteed (dist finite)

        # row-normalize with an exact divide so rows sum to 1 at f32 precision
        row_sum = jnp.sum(q, axis=1, keepdims=True)
        o_ref[...] = (q / row_sum).astype(o_ref.dtype)

    return cluster_kernel


@functools.partial(jax.jit, static_argnames=("alpha",))
def cluster_layer(z: jax.Array, network: jax.Array, alpha: float = 1.0) -> jax.Array:
    """Pallas implementation of ClusterLayer.forward.

    z:       (N, D) embeddings (any float dtype; read at native width)
    network: (K, D) cluster centers
    returns: (N, K) float32 soft assignments (rows sum to 1)
    """
    N, D = z.shape
    K, D2 = network.shape
    assert D == D2

    TILE_N = _choose_tile_n(N, D, K, jnp.dtype(z.dtype).itemsize)
    grid = (pl.cdiv(N, TILE_N),)

    # Tiny, cheap wrapper-side prep: pre-transposed f32 centers + hoisted ||mu||^2.
    w_t = network.astype(jnp.float32).T             # (D, K)
    w_sq = jnp.sum(w_t * w_t, axis=0, keepdims=True)  # (1, K)

    p = (float(alpha) + 1.0) / 2.0
    cost = pl.CostEstimate(
        flops=2 * N * D * K + 8 * N * K,
        transcendentals=0 if p in (1.0, 0.5) else 2 * N * K,
        bytes_accessed=(N * D * jnp.dtype(z.dtype).itemsize
                        + D * K * 4 + K * 4 + N * K * 4),
    )

    return pl.pallas_call(
        _make_cluster_kernel(float(alpha)),
        out_shape=jax.ShapeDtypeStruct((N, K), jnp.float32),
        grid=grid,
        in_specs=[
            pl.BlockSpec((TILE_N, D), lambda i: (i, 0)),   # z tile, pipelined
            pl.BlockSpec((D, K), lambda i: (0, 0)),        # centers, resident
            pl.BlockSpec((1, K), lambda i: (0, 0)),        # ||mu||^2, resident
        ],
        out_specs=pl.BlockSpec((TILE_N, K), lambda i: (i, 0)),
        compiler_params=pltpu.CompilerParams(
            dimension_semantics=("parallel",),             # megacore on v7x
            vmem_limit_bytes=32 * 1024 * 1024,             # raise v5e's 16 MiB default
        ),
        cost_estimate=cost,
    )(z, w_t, w_sq)


def _reference(z, network, alpha=1.0):
    # Pure-JAX replica of the PyTorch forward (broadcast form) for validation.
    diff = z[:, None, :].astype(jnp.float32) - network[None, :, :].astype(jnp.float32)
    q = 1.0 / (1.0 + jnp.sum(diff * diff, axis=2) / alpha)
    q = q ** ((alpha + 1.0) / 2.0)
    return q / jnp.sum(q, axis=1, keepdims=True)


if __name__ == "__main__":
    key = jax.random.PRNGKey(0)
    k_z, k_w = jax.random.split(key)

    N, D, K = 8, 32, 4          # batch, hidden_dim, num_clusters
    z = jax.random.normal(k_z, (N, D), dtype=jnp.float32)

    # Deterministic Xavier-normal init for `network` (num_clusters, hidden_dim).
    xavier_std = (2.0 / (K + D)) ** 0.5
    network = xavier_std * jax.random.normal(k_w, (K, D), dtype=jnp.float32)

    # default alpha = 1 (pow and 1/alpha scaling specialized away)
    q = jax.block_until_ready(cluster_layer(z, network, alpha=1.0))
    q_ref = _reference(z, network, 1.0)
    assert q.shape == (N, K)
    assert jnp.allclose(q, q_ref, atol=2e-3, rtol=2e-3), "mismatch vs reference (alpha=1)"
    assert jnp.allclose(jnp.sum(q, axis=1), 1.0, atol=1e-3), "rows must sum to 1 (alpha=1)"

    # non-trivial exponent path (alpha=2 -> p=1.5 via exp/log)
    q2 = jax.block_until_ready(cluster_layer(z, network, alpha=2.0))
    q2_ref = _reference(z, network, 2.0)
    assert jnp.allclose(q2, q2_ref, atol=5e-3, rtol=5e-3), "mismatch vs reference (alpha=2)"
    assert jnp.allclose(jnp.sum(q2, axis=1), 1.0, atol=1e-3), "rows must sum to 1 (alpha=2)"

    print("KERNEL_OK")
</pallas_src>

<mosaic_0001>
module attributes {stable_mosaic.version = 11 : i64} {
  func.func @cluster_kernel(%arg0: i32, %arg1: memref<8x32xf32, #tpu.memory_space<vmem>>, %arg2: memref<32x4xf32, #tpu.memory_space<vmem>>, %arg3: memref<1x4xf32, #tpu.memory_space<vmem>>, %arg4: memref<8x4xf32, #tpu.memory_space<vmem>>) attributes {dimension_semantics = [#tpu.dimension_semantics<parallel>], iteration_bounds = array<i64: 1>, scalar_prefetch = 0 : i64, scratch_operands = 0 : i64, tpu.core_type = #tpu.core_type<tc>, window_params = [{transform_indices = @transform_0, window_bounds = array<i64: 8, 32>}, {pipeline_mode = #tpu.pipeline_mode<synchronous>, transform_indices = @transform_1, window_bounds = array<i64: 32, 4>}, {pipeline_mode = #tpu.pipeline_mode<synchronous>, transform_indices = @transform_2, window_bounds = array<i64: 1, 4>}, {transform_indices = @transform_3, window_bounds = array<i64: 8, 4>}]} {
    %c0 = arith.constant 0 : index
    %c0_0 = arith.constant 0 : index
    %0 = vector.load %arg1[%c0, %c0_0] : memref<8x32xf32, #tpu.memory_space<vmem>>, vector<8x32xf32>
    %c0_1 = arith.constant 0 : index
    %c0_2 = arith.constant 0 : index
    %1 = vector.load %arg2[%c0_1, %c0_2] : memref<32x4xf32, #tpu.memory_space<vmem>>, vector<32x4xf32>
    %c0_3 = arith.constant 0 : index
    %c0_4 = arith.constant 0 : index
    %2 = vector.load %arg3[%c0_3, %c0_4] : memref<1x4xf32, #tpu.memory_space<vmem>>, vector<1x4xf32>
    %3 = arith.mulf %0, %0 : vector<8x32xf32>
    %cst = arith.constant dense<0.000000e+00> : vector<8xf32>
    %4 = vector.multi_reduction <add>, %3, %cst [1] : vector<8x32xf32> to vector<8xf32>
    %5 = vector.shape_cast %4 : vector<8xf32> to vector<8x1xf32>
    %cst_5 = arith.constant dense<0.000000e+00> : vector<8x4xf32>
    %6 = tpu.matmul %0, %1, %cst_5 {dimension_numbers = #tpu.dot_dimension_numbers<[1], [0], [0], [1], [0, 0, 1, 1], [], []>} : vector<8x32xf32>, vector<32x4xf32>, vector<8x4xf32> -> vector<8x4xf32>
    %7 = vector.broadcast %5 : vector<8x1xf32> to vector<8x4xf32>
    %8 = vector.broadcast %2 : vector<1x4xf32> to vector<8x4xf32>
    %9 = arith.addf %7, %8 : vector<8x4xf32>
    %cst_6 = arith.constant 2.000000e+00 : f32
    %10 = vector.broadcast %cst_6 : f32 to vector<8x4xf32>
    %11 = arith.mulf %10, %6 : vector<8x4xf32>
    %12 = arith.subf %9, %11 : vector<8x4xf32>
    %cst_7 = arith.constant 0.000000e+00 : f32
    %13 = vector.broadcast %cst_7 : f32 to vector<8x4xf32>
    %14 = arith.maximumf %12, %13 : vector<8x4xf32>
    %cst_8 = arith.constant 1.000000e+00 : f32
    %15 = vector.broadcast %cst_8 : f32 to vector<8x4xf32>
    %16 = arith.addf %15, %14 : vector<8x4xf32>
    %cst_9 = arith.constant 1.000000e+00 : f32
    %17 = vector.broadcast %cst_9 : f32 to vector<8x4xf32>
    %18 = arith.divf %17, %16 : vector<8x4xf32>
    %cst_10 = arith.constant dense<0.000000e+00> : vector<8xf32>
    %19 = vector.multi_reduction <add>, %18, %cst_10 [1] : vector<8x4xf32> to vector<8xf32>
    %20 = vector.shape_cast %19 : vector<8xf32> to vector<8x1xf32>
    %21 = vector.broadcast %20 : vector<8x1xf32> to vector<8x4xf32>
    %22 = arith.divf %18, %21 : vector<8x4xf32>
    %c0_11 = arith.constant 0 : index
    %c0_12 = arith.constant 0 : index
    %23 = vector.load %arg4[%c0_11, %c0_12] : memref<8x4xf32, #tpu.memory_space<vmem>>, vector<8x4xf32>
    tpu.vector_store %arg4[%c0_11, %c0_12], %22 {strides = array<i32>} : memref<8x4xf32, #tpu.memory_space<vmem>>, vector<8x4xf32>,
    return
  }
  func.func @transform_0(%arg0: i32) -> (i32, i32) {
    %c0_i32 = arith.constant 0 : i32
    %c0_i32_0 = arith.constant 0 : i32
    return %arg0, %c0_i32 : i32, i32
  }
  func.func @transform_1(%arg0: i32) -> (i32, i32) {
    %c0_i32 = arith.constant 0 : i32
    %c0_i32_0 = arith.constant 0 : i32
    %c0_i32_1 = arith.constant 0 : i32
    return %c0_i32, %c0_i32_0 : i32, i32
  }
  func.func @transform_2(%arg0: i32) -> (i32, i32) {
    %c0_i32 = arith.constant 0 : i32
    %c0_i32_0 = arith.constant 0 : i32
    %c0_i32_1 = arith.constant 0 : i32
    return %c0_i32, %c0_i32_0 : i32, i32
  }
  func.func @transform_3(%arg0: i32) -> (i32, i32) {
    %c0_i32 = arith.constant 0 : i32
    %c0_i32_0 = arith.constant 0 : i32
    return %arg0, %c0_i32 : i32, i32
  }
}

</mosaic_0001>

<bundles_post_ra>
// kernel: cluster_layer.1
= control target key start
LH: loop header
LB: loop body
LE: loop exit
PB: predicated region body
PF: predicated region fallthrough
CT: control target
= control target key end

     0   :  { %vm21_vm0 = vcmask 261120   ;;  %vm71_vm4 = vcmask 31744   ;;  %s144_s1 = inlined_call_operand.vmem [shape: f32[32,4], index: 1, kind: input, shape index: {}]   ;;  %s145_s0 = inlined_call_operand.vmem [shape: f32[8,32], index: 0, kind: input, shape index: {}]   ;;  %s146_s2 = inlined_call_operand.vmem [shape: f32[1,4], index: 2, kind: input, shape index: {}]   ;;  %s147_s3 = inlined_call_operand.vmem [shape: f32[8,4], index: 3, kind: output, shape index: {}]  }
   0x1   :  { %v18_v0 = vld [vmem:[%s144_s1 + $0x18] sm:$0xff]  ;;  %v17_v1 = vld [vmem:[%s144_s1 + $0x10] sm:$0xff]  ;;  %v14_v2 = vld [vmem:[%s145_s0] sm:$0xff] }
   0x2   :  { %40 = vmatpush.msra.mxu0 %v18_v0  ;;  %v16_v3 = vld [vmem:[%s144_s1 + $0x8] sm:$0xff]  ;;  %v20_v4 = vmul.f32 %v14_v2, %v14_v2  ;;  %v15_v5 = vld [vmem:[%s144_s1] sm:$0xff] }
   0x3   :  { %v96_v7 = vld [vmem:[%s146_s2] ss:$0 sm:$0xff] }
   0x4   :  { %41 = vmatpush.msra.mxu0 %v17_v1  ;;  %v22_v6 = vsel %vm21_vm0, %v20_v4, 0.0 }
   0x5   :  { %23 = vadd.xlane.f32.xlu0 %v22_v6 }
   0x6   :  { %42 = vmatpush.msra.mxu0 %v16_v3 }
   0x8   :  { %43 = vmatpush.msra.mxu0 %v15_v5 }
   0x9   :  { %95 = vmatmul.msk.f32.vlgmr.msra.gmra.mxu0 %vm21_vm0, %v14_v2 }
  0x78   :  { %v24_v8 = vpop.xlane.xlu0 %23 }
  0x79   :  { %v51_v9 = vadd.f32 %v96_v7, %v24_v8 }
  0x86   :  { %v45_v10 = vpop.f32.mrf.mxu0 }
  0x87   :  { %v52_v11 = vmul.f32 2.0, %v45_v10 }
  0x89   :  { %v53_v12 = vsub.f32 %v51_v9, %v52_v11 }
  0x8b   :  { %v54_v13 = vmax.f32 %v53_v12, 0.0 }
  0x8d   :  { %v55_v14 = vadd.f32 1.0, %v54_v13 }
  0x8f   :  { %97 = vrcp.f32 %v55_v14  ;;  %v67_v18 = vand.u32 2147483648, %v55_v14  ;;  %v65_v20 = vand.u32 2147483647, %v55_v14  ;;  %vm61_vm2 = vweird.f32 %v55_v14 }
  0x91   :  { %v68_v22 = vor.u32 1.1754944e-38, %v67_v18  ;;  %vm66_vm5 = vcmp.eq.f32.partialorder %v65_v20, 8.507059e+37 }
  0x95   :  { %v98_v15 = vpop.eup %97 }
  0x96   :  { %v57_v16 = vmul.f32 %v98_v15, %v55_v14  ;;  %vm62_vm1 = vweird.f32 %v98_v15 }
  0x97   :  { %vm63_vm3 = vmor %vm61_vm2, %vm62_vm1 }
  0x98   :  { %v58_v17 = vsub.f32 1.0, %v57_v16 }
  0x9a   :  { %v59_v19 = vmul.f32 %v98_v15, %v58_v17 }
  0x9c   :  { %v60_v21 = vadd.f32 %v98_v15, %v59_v19 }
  0x9e   :  { %v64_v23 = vsel %vm63_vm3, %v98_v15, %v60_v21 }
  0x9f   :  { %v69_v24 = vsel %vm66_vm5, %v68_v22, %v64_v23 }
  0xa0   :  { %v72_v25 = vsel %vm71_vm4, %v69_v24, 0.0 }
  0xa1   :  { %73 = vadd.xlane.f32.xlu0 %v72_v25 }
 0x114   :  { %v74_v26 = vpop.xlane.xlu0 %73 }
 0x115   :  { %99 = vrcp.f32 %v74_v26  ;;  %v86_v30 = vand.u32 2147483648, %v74_v26  ;;  %v84_v32 = vand.u32 2147483647, %v74_v26  ;;  %vm80_vm7 = vweird.f32 %v74_v26 }
 0x117   :  { %v87_v34 = vor.u32 1.1754944e-38, %v86_v30  ;;  %vm85_vm9 = vcmp.eq.f32.partialorder %v84_v32, 8.507059e+37 }
 0x11b   :  { %v100_v27 = vpop.eup %99 }
 0x11c   :  { %v76_v28 = vmul.f32 %v100_v27, %v74_v26  ;;  %vm81_vm6 = vweird.f32 %v100_v27 }
 0x11d   :  { %vm82_vm8 = vmor %vm80_vm7, %vm81_vm6 }
 0x11e   :  { %v77_v29 = vsub.f32 1.0, %v76_v28 }
 0x120   :  { %v78_v31 = vmul.f32 %v100_v27, %v77_v29 }
 0x122   :  { %v79_v33 = vadd.f32 %v100_v27, %v78_v31 }
 0x124   :  { %v83_v35 = vsel %vm82_vm8, %v100_v27, %v79_v33 }
 0x125   :  { %v88_v36 = vsel %vm85_vm9, %v87_v34, %v83_v35 }
 0x126   :  { %v89_v37 = vmul.f32 %v88_v36, %v69_v24 }
 0x128   :  { %90 = vst.msk [vmem:[%s147_s3] sm:$0xff] %vm71_vm4, %v89_v37 }

</bundles_post_ra>
